<compile_context>
chip_gen: v5e
topology: v5e:2x2
jax: 0.10.0
libtpu: 0.0.40
codegen_flags: <defaults>
</compile_context>

<pallas_src>
import jax
import jax.numpy as jnp
from jax.experimental import pallas as pl
from jax.experimental.pallas import tpu as pltpu

_IN = 784
_HIDDEN = 256
_LANE = 128
_TB = 2048  # max batch tile (multiple of 256 for MXU M granularity)


def _round_up(x, m):
    return (x + m - 1) // m * m


def _mlp_kernel(x_ref, w1_ref, b1_ref, w2_ref, b2_ref, wc_ref, bc_ref, o_ref):
    # Cast the activation tile to bf16 in-register (x stays in its HBM dtype;
    # if the caller already supplies bf16 this is a no-op).  All matmuls run on
    # the MXU in bf16 with f32 accumulation.
    x = x_ref[...].astype(jnp.bfloat16)

    # fc1 + ReLU
    h1 = jnp.dot(x, w1_ref[...], preferred_element_type=jnp.float32)
    h1 = jnp.maximum(h1 + b1_ref[...], 0.0)

    # fc2 + ReLU
    h2 = jnp.dot(h1.astype(jnp.bfloat16), w2_ref[...],
                 preferred_element_type=jnp.float32)
    h2 = jnp.maximum(h2 + b2_ref[...], 0.0)

    # classifier (no activation); output block is lane-padded to a multiple of 128
    out = jnp.dot(h2.astype(jnp.bfloat16), wc_ref[...],
                  preferred_element_type=jnp.float32)
    o_ref[...] = (out + bc_ref[...]).astype(o_ref.dtype)


def baseline_mnist_forward(x, params, task_id=0, out_dtype=jnp.float32):
    """x: (B, 1, 28, 28) or (B, 784).  task_id is ignored (as in the PyTorch forward)."""
    del task_id  # unused in the reference forward
    w1, b1, w2, b2, wc, bc = params
    B = x.shape[0]
    outputs = wc.shape[1]

    # Keep x in its incoming dtype (no wrapper-side cast -> no extra HBM pass).
    x2d = x.reshape(B, _IN)

    # bf16 weights (one-time, tiny), f32 biases.
    w1b = w1.astype(jnp.bfloat16)
    w2b = w2.astype(jnp.bfloat16)
    wcb = wc.astype(jnp.bfloat16)
    b1f = b1.astype(jnp.float32)
    b2f = b2.astype(jnp.float32)
    bcf = bc.astype(jnp.float32)

    # Zero-pad classifier width to a full lane tile (lane-dense output stores).
    out_pad = _round_up(max(outputs, 1), _LANE)
    if out_pad != outputs:
        wcb = jnp.pad(wcb, ((0, 0), (0, out_pad - outputs)))
        bcf = jnp.pad(bcf, ((0, 0), (0, out_pad - outputs)))

    # Pad the batch (multiple of 16 for bf16 sublane packing) and pick a tile:
    # guarantee >= 2 grid steps whenever bp >= 512 so the "parallel" batch axis
    # can be sharded across both v7x TensorCores.
    bp = _round_up(B, 16)
    if bp < 512:
        tb = bp
    else:
        nsteps = max(2, pl.cdiv(bp, _TB))
        tb = min(_TB, max(256, _round_up(pl.cdiv(bp, nsteps), 16)))
    bp = _round_up(bp, tb)
    if bp != B:
        x2d = jnp.pad(x2d, ((0, bp - B), (0, 0)))

    grid = (bp // tb,)

    x_item = jnp.dtype(x2d.dtype).itemsize
    out_item = jnp.dtype(out_dtype).itemsize
    w_elems = _IN * _HIDDEN + _HIDDEN * _HIDDEN + _HIDDEN * out_pad
    flops = 2 * bp * w_elems
    bytes_accessed = (
        bp * _IN * x_item            # x stream
        + 2 * w_elems                # bf16 weights (resident)
        + 4 * (2 * _HIDDEN + out_pad)  # f32 biases
        + bp * out_pad * out_item    # output writeback
    )

    out = pl.pallas_call(
        _mlp_kernel,
        out_shape=jax.ShapeDtypeStruct((bp, out_pad), out_dtype),
        grid=grid,
        in_specs=[
            pl.BlockSpec((tb, _IN), lambda i: (i, 0)),           # x tile (pipelined)
            pl.BlockSpec((_IN, _HIDDEN), lambda i: (0, 0)),      # w1 (resident, bf16)
            pl.BlockSpec((1, _HIDDEN), lambda i: (0, 0)),        # b1 (f32)
            pl.BlockSpec((_HIDDEN, _HIDDEN), lambda i: (0, 0)),  # w2 (resident, bf16)
            pl.BlockSpec((1, _HIDDEN), lambda i: (0, 0)),        # b2 (f32)
            pl.BlockSpec((_HIDDEN, out_pad), lambda i: (0, 0)),  # classifier w (padded, bf16)
            pl.BlockSpec((1, out_pad), lambda i: (0, 0)),        # classifier b (padded, f32)
        ],
        out_specs=pl.BlockSpec((tb, out_pad), lambda i: (i, 0)),
        compiler_params=pltpu.CompilerParams(
            dimension_semantics=("parallel",),
            vmem_limit_bytes=32 << 20),
        cost_estimate=pl.CostEstimate(
            flops=flops, transcendentals=0, bytes_accessed=bytes_accessed),
    )(x2d, w1b, b1f, w2b, b2f, wcb, bcf)

    # Slice the padded buffer back to the logical (B, outputs) result.
    return out[:B, :outputs]


def init_params(key, outputs=10):
    """Deterministic init mimicking nn.Linear's U(-1/sqrt(fan_in), 1/sqrt(fan_in)).

    Weights are stored as (in_features, out_features) so the kernel computes x @ W + b
    (the transpose of PyTorch's (out, in) layout).
    """
    ks = jax.random.split(key, 6)

    def linear(kw, kb, fan_in, fan_out):
        bound = 1.0 / jnp.sqrt(fan_in)
        w = jax.random.uniform(kw, (fan_in, fan_out), jnp.float32, -bound, bound)
        b = jax.random.uniform(kb, (1, fan_out), jnp.float32, -bound, bound)
        return w, b

    w1, b1 = linear(ks[0], ks[1], _IN, _HIDDEN)
    w2, b2 = linear(ks[2], ks[3], _HIDDEN, _HIDDEN)
    wc, bc = linear(ks[4], ks[5], _HIDDEN, outputs)
    return (w1, b1, w2, b2, wc, bc)


def reference_forward(x, params):
    """Pure-JAX f32 reference for correctness checking."""
    w1, b1, w2, b2, wc, bc = params
    h = x.reshape(x.shape[0], _IN)
    h = jnp.maximum(h @ w1 + b1, 0.0)
    h = jnp.maximum(h @ w2 + b2, 0.0)
    return h @ wc + bc


if __name__ == "__main__":
    key = jax.random.PRNGKey(0)
    k_x, k_p = jax.random.split(key)

    B, outputs = 2, 10
    x = jax.random.normal(k_x, (B, 1, 28, 28), jnp.float32)  # MNIST-like input
    params = init_params(k_p, outputs=outputs)

    out = baseline_mnist_forward(x, params, task_id=0)
    out = jax.block_until_ready(out)

    ref = reference_forward(x, params)
    assert out.shape == (B, outputs), out.shape
    # bf16 matmul operands (f32 accumulation) -> relaxed tolerance vs f32 reference.
    assert jnp.allclose(out, ref, atol=2e-2, rtol=2e-2), "mismatch vs reference"

    print("KERNEL_OK")
</pallas_src>

<mosaic_0001>
module attributes {stable_mosaic.version = 11 : i64} {
  func.func @_mlp_kernel(%arg0: i32, %arg1: memref<16x784xf32, #tpu.memory_space<vmem>>, %arg2: memref<784x256xbf16, #tpu.memory_space<vmem>>, %arg3: memref<1x256xf32, #tpu.memory_space<vmem>>, %arg4: memref<256x256xbf16, #tpu.memory_space<vmem>>, %arg5: memref<1x256xf32, #tpu.memory_space<vmem>>, %arg6: memref<256x128xbf16, #tpu.memory_space<vmem>>, %arg7: memref<1x128xf32, #tpu.memory_space<vmem>>, %arg8: memref<16x128xf32, #tpu.memory_space<vmem>>) attributes {dimension_semantics = [#tpu.dimension_semantics<parallel>], iteration_bounds = array<i64: 1>, scalar_prefetch = 0 : i64, scratch_operands = 0 : i64, tpu.core_type = #tpu.core_type<tc>, window_params = [{transform_indices = @transform_0, window_bounds = array<i64: 16, 784>}, {pipeline_mode = #tpu.pipeline_mode<synchronous>, transform_indices = @transform_1, window_bounds = array<i64: 784, 256>}, {pipeline_mode = #tpu.pipeline_mode<synchronous>, transform_indices = @transform_2, window_bounds = array<i64: 1, 256>}, {pipeline_mode = #tpu.pipeline_mode<synchronous>, transform_indices = @transform_3, window_bounds = array<i64: 256, 256>}, {pipeline_mode = #tpu.pipeline_mode<synchronous>, transform_indices = @transform_4, window_bounds = array<i64: 1, 256>}, {pipeline_mode = #tpu.pipeline_mode<synchronous>, transform_indices = @transform_5, window_bounds = array<i64: 256, 128>}, {pipeline_mode = #tpu.pipeline_mode<synchronous>, transform_indices = @transform_6, window_bounds = array<i64: 1, 128>}, {transform_indices = @transform_7, window_bounds = array<i64: 16, 128>}]} {
    %c0 = arith.constant 0 : index
    %c0_0 = arith.constant 0 : index
    %0 = vector.load %arg1[%c0, %c0_0] : memref<16x784xf32, #tpu.memory_space<vmem>>, vector<16x784xf32>
    %1 = arith.truncf %0 : vector<16x784xf32> to vector<16x784xbf16>
    %c0_1 = arith.constant 0 : index
    %c0_2 = arith.constant 0 : index
    %2 = vector.load %arg2[%c0_1, %c0_2] : memref<784x256xbf16, #tpu.memory_space<vmem>>, vector<784x256xbf16>
    %cst = arith.constant dense<0.000000e+00> : vector<16x256xf32>
    %3 = tpu.matmul %1, %2, %cst {dimension_numbers = #tpu.dot_dimension_numbers<[1], [0], [0], [1], [0, 0, 1, 1], [], []>} : vector<16x784xbf16>, vector<784x256xbf16>, vector<16x256xf32> -> vector<16x256xf32>
    %c0_3 = arith.constant 0 : index
    %c0_4 = arith.constant 0 : index
    %4 = vector.load %arg3[%c0_3, %c0_4] : memref<1x256xf32, #tpu.memory_space<vmem>>, vector<1x256xf32>
    %5 = vector.broadcast %4 : vector<1x256xf32> to vector<16x256xf32>
    %6 = arith.addf %3, %5 : vector<16x256xf32>
    %cst_5 = arith.constant 0.000000e+00 : f32
    %7 = vector.broadcast %cst_5 : f32 to vector<16x256xf32>
    %8 = arith.maximumf %6, %7 : vector<16x256xf32>
    %9 = arith.truncf %8 : vector<16x256xf32> to vector<16x256xbf16>
    %c0_6 = arith.constant 0 : index
    %c0_7 = arith.constant 0 : index
    %10 = vector.load %arg4[%c0_6, %c0_7] : memref<256x256xbf16, #tpu.memory_space<vmem>>, vector<256x256xbf16>
    %cst_8 = arith.constant dense<0.000000e+00> : vector<16x256xf32>
    %11 = tpu.matmul %9, %10, %cst_8 {dimension_numbers = #tpu.dot_dimension_numbers<[1], [0], [0], [1], [0, 0, 1, 1], [], []>} : vector<16x256xbf16>, vector<256x256xbf16>, vector<16x256xf32> -> vector<16x256xf32>
    %c0_9 = arith.constant 0 : index
    %c0_10 = arith.constant 0 : index
    %12 = vector.load %arg5[%c0_9, %c0_10] : memref<1x256xf32, #tpu.memory_space<vmem>>, vector<1x256xf32>
    %13 = vector.broadcast %12 : vector<1x256xf32> to vector<16x256xf32>
    %14 = arith.addf %11, %13 : vector<16x256xf32>
    %cst_11 = arith.constant 0.000000e+00 : f32
    %15 = vector.broadcast %cst_11 : f32 to vector<16x256xf32>
    %16 = arith.maximumf %14, %15 : vector<16x256xf32>
    %17 = arith.truncf %16 : vector<16x256xf32> to vector<16x256xbf16>
    %c0_12 = arith.constant 0 : index
    %c0_13 = arith.constant 0 : index
    %18 = vector.load %arg6[%c0_12, %c0_13] : memref<256x128xbf16, #tpu.memory_space<vmem>>, vector<256x128xbf16>
    %cst_14 = arith.constant dense<0.000000e+00> : vector<16x128xf32>
    %19 = tpu.matmul %17, %18, %cst_14 {dimension_numbers = #tpu.dot_dimension_numbers<[1], [0], [0], [1], [0, 0, 1, 1], [], []>} : vector<16x256xbf16>, vector<256x128xbf16>, vector<16x128xf32> -> vector<16x128xf32>
    %c0_15 = arith.constant 0 : index
    %c0_16 = arith.constant 0 : index
    %20 = vector.load %arg7[%c0_15, %c0_16] : memref<1x128xf32, #tpu.memory_space<vmem>>, vector<1x128xf32>
    %21 = vector.broadcast %20 : vector<1x128xf32> to vector<16x128xf32>
    %22 = arith.addf %19, %21 : vector<16x128xf32>
    %c0_17 = arith.constant 0 : index
    %c0_18 = arith.constant 0 : index
    %23 = vector.load %arg8[%c0_17, %c0_18] : memref<16x128xf32, #tpu.memory_space<vmem>>, vector<16x128xf32>
    tpu.vector_store %arg8[%c0_17, %c0_18], %22 {strides = array<i32>} : memref<16x128xf32, #tpu.memory_space<vmem>>, vector<16x128xf32>,
    return
  }
  func.func @transform_0(%arg0: i32) -> (i32, i32) {
    %c0_i32 = arith.constant 0 : i32
    %c0_i32_0 = arith.constant 0 : i32
    return %arg0, %c0_i32 : i32, i32
  }
  func.func @transform_1(%arg0: i32) -> (i32, i32) {
    %c0_i32 = arith.constant 0 : i32
    %c0_i32_0 = arith.constant 0 : i32
    %c0_i32_1 = arith.constant 0 : i32
    return %c0_i32, %c0_i32_0 : i32, i32
  }
  func.func @transform_2(%arg0: i32) -> (i32, i32) {
    %c0_i32 = arith.constant 0 : i32
    %c0_i32_0 = arith.constant 0 : i32
    %c0_i32_1 = arith.constant 0 : i32
    return %c0_i32, %c0_i32_0 : i32, i32
  }
  func.func @transform_3(%arg0: i32) -> (i32, i32) {
    %c0_i32 = arith.constant 0 : i32
    %c0_i32_0 = arith.constant 0 : i32
    %c0_i32_1 = arith.constant 0 : i32
    return %c0_i32, %c0_i32_0 : i32, i32
  }
  func.func @transform_4(%arg0: i32) -> (i32, i32) {
    %c0_i32 = arith.constant 0 : i32
    %c0_i32_0 = arith.constant 0 : i32
    %c0_i32_1 = arith.constant 0 : i32
    return %c0_i32, %c0_i32_0 : i32, i32
  }
  func.func @transform_5(%arg0: i32) -> (i32, i32) {
    %c0_i32 = arith.constant 0 : i32
    %c0_i32_0 = arith.constant 0 : i32
    %c0_i32_1 = arith.constant 0 : i32
    return %c0_i32, %c0_i32_0 : i32, i32
  }
  func.func @transform_6(%arg0: i32) -> (i32, i32) {
    %c0_i32 = arith.constant 0 : i32
    %c0_i32_0 = arith.constant 0 : i32
    %c0_i32_1 = arith.constant 0 : i32
    return %c0_i32, %c0_i32_0 : i32, i32
  }
  func.func @transform_7(%arg0: i32) -> (i32, i32) {
    %c0_i32 = arith.constant 0 : i32
    %c0_i32_0 = arith.constant 0 : i32
    return %arg0, %c0_i32 : i32, i32
  }
}

</mosaic_0001>

<bundles_post_ra>
// kernel: tpu_custom_call.1
= control target key start
LH: loop header
LB: loop body
LE: loop exit
PB: predicated region body
PF: predicated region fallthrough
CT: control target
= control target key end

     0   :  { %12 = vsyncpa [#allocation3], 0  ;;  %s2384_s0 = inlined_call_operand.hbm [shape: f32[16,784], index: 0, kind: input, shape index: {}]   ;;  %s2385_s1 = inlined_call_operand.hbm [shape: bf16[784,256], index: 1, kind: input, shape index: {}]   ;;  %s2386_s2 = inlined_call_operand.hbm [shape: f32[1,256], index: 2, kind: input, shape index: {}]   ;;  %s2387_s3 = inlined_call_operand.hbm [shape: bf16[256,256], index: 3, kind: input, shape index: {}]   ;;  %s2388_s4 = inlined_call_operand.vmem [shape: f32[1,256], index: 4, kind: input, shape index: {}]   ;;  %s2389_s5 = inlined_call_operand.hbm [shape: bf16[256,128], index: 5, kind: input, shape index: {}]   ;;  %s2390_s6 = inlined_call_operand.vmem [shape: f32[1,128], index: 6, kind: input, shape index: {}]   ;;  %s2391_s7 = inlined_call_operand.hbm [shape: f32[16,128], index: 7, kind: output, shape index: {}]  }
   0x1   :  { %13 = vsyncpa [#allocation6], 0 }
   0x2   :  { %14 = vsyncpa [#allocation9], 0  ;;  %s33_s26 = sshll.u32 %s2385_s1, 4  ;;  %s34_s26 = int_to_ptr.hbm [resolvable:$true] %s33_s26 }
   0x3   :  { %15 = vsyncpa [#allocation4], 0  ;;  %s2265_s27 = smov [#allocation5]   ;;  %s57_s8 = sshll.u32 %s2387_s3, 4  ;;  %s58_s8 = int_to_ptr.hbm [resolvable:$true] %s57_s8 }
   0x4   :  { %s35_s28 = sshll.u32 %s2265_s27, 4  ;;  %s2266_s9 = smov 128   ;;  %s36_s28 = int_to_ptr.vmem [resolvable:$true] %s35_s28 }
   0x5   :  { %s2267_s10 = smov 8   ;;  %s2268_s11 = smov [#allocation8]  }
   0x6   :  { %41 = dma.hbm_to_vmem [thread:$0]  %s34_s26, 12544, %s36_s28, [#allocation6], %s2266_s9, %s2266_s9, %s2267_s10  }
   0x7   :  { %s59_s12 = sshll.u32 %s2268_s11, 4  ;;  %s20_s14 = sshll.u32 %s2384_s0, 4  ;;  %s60_s12 = int_to_ptr.vmem [resolvable:$true] %s59_s12  ;;  %s21_s14 = int_to_ptr.hbm [resolvable:$true] %s20_s14 }
   0x8   :  { %65 = dma.hbm_to_vmem [thread:$0]  %s58_s8, 4096, %s60_s12, [#allocation9], %s2266_s9, %s2266_s9, %s2267_s10  }
   0x9   :  { %s2269_s3 = smov [#allocation2]   ;;  %s47_s18 = sshll.u32 %s2386_s2, 4  ;;  %s48_s18 = int_to_ptr.hbm [resolvable:$true] %s47_s18 }
   0xa   :  { %s22_s15 = sshll.u32 %s2269_s3, 4  ;;  %s2270_s19 = smov 896   ;;  %s23_s15 = int_to_ptr.vmem [resolvable:$true] %s22_s15 }
   0xb   :  { %s2271_s20 = smov 56   ;;  %s2272_s21 = smov [#allocation7]  }
   0xc   :  { %28 = dma.hbm_to_vmem [thread:$0]  %s21_s14, 1792, %s23_s15, [#allocation3], %s2270_s19, %s2270_s19, %s2271_s20  }
   0xd   :  { %s49_s22 = sshll.u32 %s2272_s21, 4  ;;  %s72_s24 = sshll.u32 %s2389_s5, 4  ;;  %s50_s22 = int_to_ptr.vmem [resolvable:$true] %s49_s22  ;;  %s73_s24 = int_to_ptr.hbm [resolvable:$true] %s72_s24 }
   0xe   :  { %52 = dma.hbm_to_vmem [thread:$0]  %s48_s18, 32, %s50_s22, [#allocation6]  }
   0xf   :  { %s2273_s25 = smov [#allocation10]   ;;  %s2274_s27 = smov 64  }
  0x10   :  { %s74_s26 = sshll.u32 %s2273_s25, 4  ;;  %s2275_s28 = smov 4   ;;  %s75_s26 = int_to_ptr.vmem [resolvable:$true] %s74_s26 }
  0x11   :  { %80 = dma.hbm_to_vmem [thread:$0]  %s73_s24, 2048, %s75_s26, [#allocation9], %s2274_s27, %s2274_s27, %s2275_s28  }
  0x12   :  { %2257 = dma.done.wait [#allocation3], 1792  }
  0x13   :  { %2258 = vsyncadd [#allocation3], 4294965504 }
  0x14   :  { %2259 = dma.done.wait [#allocation6], 12576  }
  0x15   :  { %2260 = vsyncadd [#allocation6], 4294954720 }
  0x16   :  { %2261 = dma.done.wait [#allocation9], 6144  }
  0x17   :  { %2262 = vsyncadd [#allocation9], 4294961152  ;;  %v1426_v0 = vld [vmem:[#allocation5 + $0x70] sm:$0xf]  ;;  %v1969_v1 = vld [vmem:[#allocation5 + $0x74] sm:$0xf0] }
  0x18   :  { %v1554_v2 = vld [vmem:[#allocation5 + $0x170] sm:$0xf]  ;;  %v1427_v3 = vor.u32 %v1969_v1, %v1426_v0  ;;  %v2001_v4 = vld [vmem:[#allocation5 + $0x174] sm:$0xf0]  ;;  %v1418_v11 = vld [vmem:[#allocation5 + $0x60] sm:$0xf] }
  0x19   :  { %v1618_v5 = vld [vmem:[#allocation5 + $0x1f0] sm:$0xf]  ;;  %v2017_v6 = vld [vmem:[#allocation5 + $0x1f4] sm:$0xf0]  ;;  %v1555_v7 = vor.u32 %v2001_v4, %v1554_v2  ;;  %v1967_v13 = vld [vmem:[#allocation5 + $0x64] sm:$0xf0] }
  0x1a   :  { %v1619_v8 = vor.u32 %v2017_v6, %v1618_v5  ;;  %v1490_v9 = vld [vmem:[#allocation5 + $0xf0] sm:$0xf]  ;;  %v1985_v10 = vld [vmem:[#allocation5 + $0xf4] sm:$0xf0]  ;;  %723 = vmatpush.bf16.msra.mxu0 %v1427_v3  ;;  %v1546_v14 = vld [vmem:[#allocation5 + $0x160] sm:$0xf]  ;;  %v1419_v16 = vor.u32 %v1967_v13, %v1418_v11 }
  0x1b   :  { %v1491_v12 = vor.u32 %v1985_v10, %v1490_v9  ;;  %v1999_v15 = vld [vmem:[#allocation5 + $0x164] sm:$0xf0]  ;;  %751 = vmatpush.bf16.msra.mxu2 %v1555_v7  ;;  %v1610_v18 = vld [vmem:[#allocation5 + $0x1e0] sm:$0xf]  ;;  %v1410_v23 = vld [vmem:[#allocation5 + $0x50] sm:$0xf] }
  0x1c   :  { %765 = vmatpush.bf16.msra.mxu3 %v1619_v8  ;;  %v1547_v17 = vor.u32 %v1999_v15, %v1546_v14  ;;  %v2015_v19 = vld [vmem:[#allocation5 + $0x1e4] sm:$0xf0]  ;;  %v1482_v20 = vld [vmem:[#allocation5 + $0xe0] sm:$0xf]  ;;  %v1965_v24 = vld [vmem:[#allocation5 + $0x54] sm:$0xf0] }
  0x1d   :  { %737 = vmatpush.bf16.msra.mxu1 %v1491_v12  ;;  %v1611_v21 = vor.u32 %v2015_v19, %v1610_v18  ;;  %v1983_v22 = vld [vmem:[#allocation5 + $0xe4] sm:$0xf0]  ;;  %v1538_v26 = vld [vmem:[#allocation5 + $0x150] sm:$0xf]  ;;  %v1997_v27 = vld [vmem:[#allocation5 + $0x154] sm:$0xf0]  ;;  %v1411_v29 = vor.u32 %v1965_v24, %v1410_v23 }
  0x1e   :  { %v1483_v25 = vor.u32 %v1983_v22, %v1482_v20  ;;  %v1602_v28 = vld [vmem:[#allocation5 + $0x1d0] sm:$0xf]  ;;  %724 = vmatpush.bf16.msra.mxu0 %v1419_v16  ;;  %v2013_v30 = vld [vmem:[#allocation5 + $0x1d4] sm:$0xf0]  ;;  %v1539_v33 = vor.u32 %v1997_v27, %v1538_v26  ;;  %v1402_v35 = vld [vmem:[#allocation5 + $0x40] sm:$0xf] }
  0x1f   :  { %v1474_v31 = vld [vmem:[#allocation5 + $0xd0] sm:$0xf]  ;;  %v1981_v32 = vld [vmem:[#allocation5 + $0xd4] sm:$0xf0]  ;;  %752 = vmatpush.bf16.msra.mxu2 %v1547_v17  ;;  %v1603_v34 = vor.u32 %v2013_v30, %v1602_v28  ;;  %v1963_v36 = vld [vmem:[#allocation5 + $0x44] sm:$0xf0] }
  0x20   :  { %766 = vmatpush.bf16.msra.mxu3 %v1611_v21  ;;  %v1530_v37 = vld [vmem:[#allocation5 + $0x140] sm:$0xf]  ;;  %v1475_v38 = vor.u32 %v1981_v32, %v1474_v31  ;;  %v1995_v39 = vld [vmem:[#allocation5 + $0x144] sm:$0xf0]  ;;  %v1403_v44 = vor.u32 %v1963_v36, %v1402_v35  ;;  %v1394_v47 = vld [vmem:[#allocation5 + $0x30] sm:$0xf] }
  0x21   :  { %738 = vmatpush.bf16.msra.mxu1 %v1483_v25  ;;  %v1594_v40 = vld [vmem:[#allocation5 + $0x1c0] sm:$0xf]  ;;  %v2011_v41 = vld [vmem:[#allocation5 + $0x1c4] sm:$0xf0]  ;;  %v1531_v45 = vor.u32 %v1995_v39, %v1530_v37  ;;  %v1961_v48 = vld [vmem:[#allocation5 + $0x34] sm:$0xf0] }
  0x22   :  { %v1466_v42 = vld [vmem:[#allocation5 + $0xc0] sm:$0xf]  ;;  %v1979_v43 = vld [vmem:[#allocation5 + $0xc4] sm:$0xf0]  ;;  %725 = vmatpush.bf16.msra.mxu0 %v1411_v29  ;;  %v1595_v46 = vor.u32 %v2011_v41, %v1594_v40  ;;  %v1522_v49 = vld [vmem:[#allocation5 + $0x130] sm:$0xf]  ;;  %v1395_v56 = vor.u32 %v1961_v48, %v1394_v47 }
  0x23   :  { %753 = vmatpush.bf16.msra.mxu2 %v1539_v33  ;;  %v1467_v50 = vor.u32 %v1979_v43, %v1466_v42  ;;  %v1993_v51 = vld [vmem:[#allocation5 + $0x134] sm:$0xf0]  ;;  %v1586_v52 = vld [vmem:[#allocation5 + $0x1b0] sm:$0xf]  ;;  %v1386_v59 = vld [vmem:[#allocation5 + $0x20] sm:$0xf] }
  0x24   :  { %767 = vmatpush.bf16.msra.mxu3 %v1603_v34  ;;  %v2009_v53 = vld [vmem:[#allocation5 + $0x1b4] sm:$0xf0]  ;;  %v1458_v54 = vld [vmem:[#allocation5 + $0xb0] sm:$0xf]  ;;  %v1523_v57 = vor.u32 %v1993_v51, %v1522_v49  ;;  %v1959_v60 = vld [vmem:[#allocation5 + $0x24] sm:$0xf0] }
  0x25   :  { %739 = vmatpush.bf16.msra.mxu1 %v1475_v38  ;;  %v1977_v55 = vld [vmem:[#allocation5 + $0xb4] sm:$0xf0]  ;;  %v1587_v58 = vor.u32 %v2009_v53, %v1586_v52  ;;  %v1514_v61 = vld [vmem:[#allocation5 + $0x120] sm:$0xf]  ;;  %v1991_v63 = vld [vmem:[#allocation5 + $0x124] sm:$0xf0]  ;;  %v1387_v4 = vor.u32 %v1959_v60, %v1386_v59 }
  0x26   :  { %726 = vmatpush.bf16.msra.mxu0 %v1403_v44  ;;  %v1459_v62 = vor.u32 %v1977_v55, %v1458_v54  ;;  %v1578_v0 = vld [vmem:[#allocation5 + $0x1a0] sm:$0xf]  ;;  %v2007_v1 = vld [vmem:[#allocation5 + $0x1a4] sm:$0xf0]  ;;  %v1378_v5 = vld [vmem:[#allocation5 + $0x10] sm:$0xf]  ;;  %v1515_v6 = vor.u32 %v1991_v63, %v1514_v61 }
  0x27   :  { %754 = vmatpush.bf16.msra.mxu2 %v1531_v45  ;;  %v1450_v2 = vld [vmem:[#allocation5 + $0xa0] sm:$0xf]  ;;  %v1975_v3 = vld [vmem:[#allocation5 + $0xa4] sm:$0xf0]  ;;  %v1579_v7 = vor.u32 %v2007_v1, %v1578_v0  ;;  %v1957_v8 = vld [vmem:[#allocation5 + $0x14] sm:$0xf0] }
  0x28   :  { %768 = vmatpush.bf16.msra.mxu3 %v1595_v46  ;;  %v1506_v9 = vld [vmem:[#allocation5 + $0x110] sm:$0xf]  ;;  %v1989_v10 = vld [vmem:[#allocation5 + $0x114] sm:$0xf0]  ;;  %v1451_v11 = vor.u32 %v1975_v3, %v1450_v2  ;;  %v1370_v16 = vld [vmem:[#allocation5] sm:$0xf]  ;;  %v1379_v18 = vor.u32 %v1957_v8, %v1378_v5 }
  0x29   :  { %740 = vmatpush.bf16.msra.mxu1 %v1467_v50  ;;  %v1570_v12 = vld [vmem:[#allocation5 + $0x190] sm:$0xf]  ;;  %v2005_v13 = vld [vmem:[#allocation5 + $0x194] sm:$0xf0]  ;;  %v1955_v17 = vld [vmem:[#allocation5 + $0x4] sm:$0xf0]  ;;  %v1507_v23 = vor.u32 %v1989_v10, %v1506_v9 }
  0x2a   :  { %727 = vmatpush.bf16.msra.mxu0 %v1395_v56  ;;  %v1442_v14 = vld [vmem:[#allocation5 + $0x90] sm:$0xf]  ;;  %v1973_v15 = vld [vmem:[#allocation5 + $0x94] sm:$0xf0]  ;;  %v1498_v19 = vld [vmem:[#allocation5 + $0x100] sm:$0xf]  ;;  %v1571_v24 = vor.u32 %v2005_v13, %v1570_v12  ;;  %v1371_v35 = vor.u32 %v1955_v17, %v1370_v16 }
  0x2b   :  { %755 = vmatpush.bf16.msra.mxu2 %v1523_v57  ;;  %v1987_v20 = vld [vmem:[#allocation5 + $0x104] sm:$0xf0]  ;;  %v1562_v21 = vld [vmem:[#allocation5 + $0x180] sm:$0xf]  ;;  %v1682_v25 = vld [vmem:[#allocation5 + $0x270] sm:$0xf]  ;;  %v1443_v28 = vor.u32 %v1973_v15, %v1442_v14 }
  0x2c   :  { %769 = vmatpush.bf16.msra.mxu3 %v1587_v58  ;;  %v2003_v22 = vld [vmem:[#allocation5 + $0x184] sm:$0xf0]  ;;  %v2033_v26 = vld [vmem:[#allocation5 + $0x274] sm:$0xf0]  ;;  %v1968_v27 = vld [vmem:[#allocation5 + $0x74] sm:$0xf]  ;;  %v1499_v39 = vor.u32 %v1987_v20, %v1498_v19 }
  0x2d   :  { %741 = vmatpush.bf16.msra.mxu1 %v1459_v62  ;;  %v1428_v29 = vld [vmem:[#allocation5 + $0x78] sm:$0xf0]  ;;  %v1434_v30 = vld [vmem:[#allocation5 + $0x80] sm:$0xf]  ;;  %v1971_v31 = vld [vmem:[#allocation5 + $0x84] sm:$0xf0]  ;;  %v1563_v40 = vor.u32 %v2003_v22, %v1562_v21  ;;  %v1683_v44 = vor.u32 %v2033_v26, %v1682_v25 }
  0x2e   :  { %728 = vmatpush.bf16.msra.mxu0 %v1387_v4  ;;  %v106_v32 = vld [vmem:[#allocation2 + $0x10] sm:$0xff]  ;;  %v113_v33 = vld [vmem:[#allocation2 + $0x48] sm:$0xff]  ;;  %v1746_v34 = vld [vmem:[#allocation5 + $0x2f0] sm:$0xf]  ;;  %v1431_v45 = vor.u32 %v1968_v27, %v1428_v29  ;;  %v1435_v49 = vor.u32 %v1971_v31, %v1434_v30  ;;  %vm719_vm0 = vcmask 130048   ;;  %s2276_s30 = smov [#allocation11]  }
  0x2f   :  { %756 = vmatpush.bf16.msra.mxu2 %v1515_v6  ;;  %v2049_v36 = vld [vmem:[#allocation5 + $0x2f4] sm:$0xf0]  ;;  %v1754_v37 = vld [vmem:[#allocation5 + $0x300] sm:$0xf]  ;;  %v2051_v38 = vld [vmem:[#allocation5 + $0x304] sm:$0xf0]  ;;  %v2338_v54 = vpack.c.bf16 %v113_v33, %v106_v32 }
  0x30   :  { %770 = vmatpush.bf16.msra.mxu3 %v1579_v7  ;;  %v1984_v41 = vld [vmem:[#allocation5 + $0xf4] sm:$0xf]  ;;  %v1492_v42 = vld [vmem:[#allocation5 + $0xf8] sm:$0xf0]  ;;  %v111_v46 = vld [vmem:[#allocation2 + $0x38] sm:$0xff]  ;;  %v1755_v50 = vor.u32 %v2051_v38, %v1754_v37  ;;  %v1747_v55 = vor.u32 %v2049_v36, %v1746_v34  ;;  %s1351_s8 = sshll.u32 %s2276_s30, 4  ;;  %s1352_s8 = int_to_ptr.vmem [resolvable:$true] %s1351_s8 }
  0x31   :  { %742 = vmatpush.bf16.msra.mxu1 %v1451_v11  ;;  %v104_v43 = vld [vmem:[#allocation2] sm:$0xff]  ;;  %v107_v47 = vld [vmem:[#allocation2 + $0x18] sm:$0xff]  ;;  %v114_v48 = vld [vmem:[#allocation2 + $0x50] sm:$0xff]  ;;  %v1495_v59 = vor.u32 %v1984_v41, %v1492_v42  ;;  %s1353_s13 = sshll.u32 %s2391_s7, 4  ;;  %s1354_s13 = int_to_ptr.hbm [resolvable:$true] %s1353_s13 }
  0x32   :  { %729 = vmatpush.bf16.msra.mxu0 %v1379_v18  ;;  %v1674_v51 = vld [vmem:[#allocation5 + $0x260] sm:$0xf]  ;;  %v2031_v52 = vld [vmem:[#allocation5 + $0x264] sm:$0xf0]  ;;  %v1966_v53 = vld [vmem:[#allocation5 + $0x64] sm:$0xf]  ;;  %v2340_v60 = vpack.c.bf16 %v111_v46, %v104_v43  ;;  %v2342_v63 = vpack.c.bf16 %v114_v48, %v107_v47 }
  0x33   :  { %757 = vmatpush.bf16.msra.mxu2 %v1507_v23  ;;  %v1420_v56 = vld [vmem:[#allocation5 + $0x68] sm:$0xf0]  ;;  %v105_v57 = vld [vmem:[#allocation2 + $0x8] sm:$0xff]  ;;  %v112_v58 = vld [vmem:[#allocation2 + $0x40] sm:$0xff]  ;;  %v1675_v0 = vor.u32 %v2031_v52, %v1674_v51 }
  0x34   :  { %771 = vmatpush.bf16.msra.mxu3 %v1571_v24  ;;  %v1738_v61 = vld [vmem:[#allocation5 + $0x2e0] sm:$0xf]  ;;  %v2047_v62 = vld [vmem:[#allocation5 + $0x2e4] sm:$0xf0]  ;;  %v1982_v1 = vld [vmem:[#allocation5 + $0xe4] sm:$0xf]  ;;  %v1423_v3 = vor.u32 %v1966_v53, %v1420_v56  ;;  %v2344_v4 = vpack.c.bf16 %v112_v58, %v105_v57 }
  0x35   :  { %743 = vmatpush.bf16.msra.mxu1 %v1443_v28  ;;  %v1484_v2 = vld [vmem:[#allocation5 + $0xe8] sm:$0xf0]  ;;  %v1666_v5 = vld [vmem:[#allocation5 + $0x250] sm:$0xf]  ;;  %v2029_v6 = vld [vmem:[#allocation5 + $0x254] sm:$0xf0]  ;;  %v1739_v7 = vor.u32 %v2047_v62, %v1738_v61 }
  0x36   :  { %730 = vmatpush.bf16.msra.mxu0 %v1371_v35  ;;  %v1964_v8 = vld [vmem:[#allocation5 + $0x54] sm:$0xf]  ;;  %v1412_v9 = vld [vmem:[#allocation5 + $0x58] sm:$0xf0]  ;;  %v1487_v10 = vor.u32 %v1982_v1, %v1484_v2  ;;  %v1730_v11 = vld [vmem:[#allocation5 + $0x2d0] sm:$0xf]  ;;  %v1667_v13 = vor.u32 %v2029_v6, %v1666_v5 }
  0x37   :  { %758 = vmatpush.bf16.msra.mxu2 %v1499_v39  ;;  %v2045_v12 = vld [vmem:[#allocation5 + $0x2d4] sm:$0xf0]  ;;  %v1980_v14 = vld [vmem:[#allocation5 + $0xd4] sm:$0xf]  ;;  %v1476_v15 = vld [vmem:[#allocation5 + $0xd8] sm:$0xf0]  ;;  %v1415_v16 = vor.u32 %v1964_v8, %v1412_v9 }
  0x38   :  { %772 = vmatpush.bf16.msra.mxu3 %v1563_v40  ;;  %v1658_v17 = vld [vmem:[#allocation5 + $0x240] sm:$0xf]  ;;  %v2027_v18 = vld [vmem:[#allocation5 + $0x244] sm:$0xf0]  ;;  %v1731_v19 = vor.u32 %v2045_v12, %v1730_v11  ;;  %v1962_v20 = vld [vmem:[#allocation5 + $0x44] sm:$0xf]  ;;  %v1479_v22 = vor.u32 %v1980_v14, %v1476_v15 }
  0x39   :  { %744 = vmatpush.bf16.msra.mxu1 %v1435_v49  ;;  %731 = vmatmul.bf16.vlgmr.msra.gmra.mxu0 %v2340_v60  ;;  %v1404_v21 = vld [vmem:[#allocation5 + $0x48] sm:$0xf0]  ;;  %v1722_v23 = vld [vmem:[#allocation5 + $0x2c0] sm:$0xf]  ;;  %v2043_v24 = vld [vmem:[#allocation5 + $0x2c4] sm:$0xf0]  ;;  %v1659_v25 = vor.u32 %v2027_v18, %v1658_v17 }
  0x3a   :  { %779 = vmatpush.bf16.msrb.mxu0 %v1683_v44  ;;  %759 = vmatmul.bf16.vlgmr.msra.gmra.mxu2 %v2338_v54  ;;  %v1978_v26 = vld [vmem:[#allocation5 + $0xc4] sm:$0xf]  ;;  %v1468_v27 = vld [vmem:[#allocation5 + $0xc8] sm:$0xf0]  ;;  %v1407_v28 = vor.u32 %v1962_v20, %v1404_v21  ;;  %v1650_v29 = vld [vmem:[#allocation5 + $0x230] sm:$0xf]  ;;  %v1723_v31 = vor.u32 %v2043_v24, %v1722_v23 }
  0x3b   :  { %814 = vmatpush.bf16.msrb.mxu2 %v1755_v50  ;;  %773 = vmatmul.bf16.vlgmr.msra.gmra.mxu3 %v2342_v63  ;;  %v2025_v30 = vld [vmem:[#allocation5 + $0x234] sm:$0xf0]  ;;  %v1960_v32 = vld [vmem:[#allocation5 + $0x34] sm:$0xf]  ;;  %v1396_v33 = vld [vmem:[#allocation5 + $0x38] sm:$0xf0]  ;;  %v1471_v35 = vor.u32 %v1978_v26, %v1468_v27 }
  0x3c   :  { %821 = vmatpush.bf16.msrb.mxu3 %v1431_v45  ;;  %745 = vmatmul.bf16.vlgmr.msra.gmra.mxu1 %v2344_v4  ;;  %v1714_v34 = vld [vmem:[#allocation5 + $0x2b0] sm:$0xf]  ;;  %v2041_v36 = vld [vmem:[#allocation5 + $0x2b4] sm:$0xf0]  ;;  %v110_v37 = vld [vmem:[#allocation2 + $0x30] sm:$0xff]  ;;  %v1651_v39 = vor.u32 %v2025_v30, %v1650_v29  ;;  %v1399_v42 = vor.u32 %v1960_v32, %v1396_v33 }
  0x3d   :  { %793 = vmatpush.bf16.msrb.mxu1 %v1747_v55  ;;  %v117_v38 = vld [vmem:[#allocation2 + $0x68] sm:$0xff]  ;;  %v1976_v40 = vld [vmem:[#allocation5 + $0xb4] sm:$0xf]  ;;  %v1642_v43 = vld [vmem:[#allocation5 + $0x220] sm:$0xf]  ;;  %v1715_v45 = vor.u32 %v2041_v36, %v1714_v34 }
  0x3e   :  { %780 = vmatpush.bf16.msrb.mxu0 %v1675_v0  ;;  %v1460_v41 = vld [vmem:[#allocation5 + $0xb8] sm:$0xf0]  ;;  %v2023_v44 = vld [vmem:[#allocation5 + $0x224] sm:$0xf0]  ;;  %v1958_v46 = vld [vmem:[#allocation5 + $0x24] sm:$0xf]  ;;  %v2350_v48 = vpack.c.bf16 %v117_v38, %v110_v37 }
  0x3f   :  { %835 = vmatpush.bf16.msra.mxu2 %v1495_v59  ;;  %v1388_v47 = vld [vmem:[#allocation5 + $0x28] sm:$0xf0]  ;;  %v1463_v49 = vor.u32 %v1976_v40, %v1460_v41  ;;  %v1706_v50 = vld [vmem:[#allocation5 + $0x2a0] sm:$0xf]  ;;  %v2039_v51 = vld [vmem:[#allocation5 + $0x2a4] sm:$0xf0]  ;;  %v1643_v52 = vor.u32 %v2023_v44, %v1642_v43 }
  0x40   :  { %822 = vmatpush.bf16.msrb.mxu3 %v1423_v3  ;;  %v1974_v53 = vld [vmem:[#allocation5 + $0xa4] sm:$0xf]  ;;  %v1452_v55 = vld [vmem:[#allocation5 + $0xa8] sm:$0xf0]  ;;  %v1391_v56 = vor.u32 %v1958_v46, %v1388_v47  ;;  %v1634_v57 = vld [vmem:[#allocation5 + $0x210] sm:$0xf]  ;;  %v1707_v61 = vor.u32 %v2039_v51, %v1706_v50 }
  0x41   :  { %794 = vmatpush.bf16.msrb.mxu1 %v1739_v7  ;;  %v2021_v58 = vld [vmem:[#allocation5 + $0x214] sm:$0xf0]  ;;  %v1956_v59 = vld [vmem:[#allocation5 + $0x14] sm:$0xf]  ;;  %v1380_v62 = vld [vmem:[#allocation5 + $0x18] sm:$0xf0]  ;;  %v1455_v2 = vor.u32 %v1974_v53, %v1452_v55 }
  0x42   :  { %781 = vmatpush.bf16.msrb.mxu0 %v1667_v13  ;;  %v1698_v0 = vld [vmem:[#allocation5 + $0x290] sm:$0xf]  ;;  %v2037_v1 = vld [vmem:[#allocation5 + $0x294] sm:$0xf0]  ;;  %v1972_v3 = vld [vmem:[#allocation5 + $0x94] sm:$0xf]  ;;  %v1635_v7 = vor.u32 %v2021_v58, %v1634_v57  ;;  %v1383_v11 = vor.u32 %v1956_v59, %v1380_v62 }
  0x43   :  { %836 = vmatpush.bf16.msra.mxu2 %v1487_v10  ;;  %v1444_v5 = vld [vmem:[#allocation5 + $0x98] sm:$0xf0]  ;;  %v1626_v6 = vld [vmem:[#allocation5 + $0x200] sm:$0xf]  ;;  %v2019_v8 = vld [vmem:[#allocation5 + $0x204] sm:$0xf0]  ;;  %v1699_v15 = vor.u32 %v2037_v1, %v1698_v0 }
  0x44   :  { %823 = vmatpush.bf16.msrb.mxu3 %v1415_v16  ;;  %v1954_v9 = vld [vmem:[#allocation5 + $0x4] sm:$0xf]  ;;  %v1372_v10 = vld [vmem:[#allocation5 + $0x8] sm:$0xf0]  ;;  %v2000_v12 = vld [vmem:[#allocation5 + $0x174] sm:$0xf]  ;;  %v1627_v23 = vor.u32 %v2019_v8, %v1626_v6 }
  0x45   :  { %795 = vmatpush.bf16.msrb.mxu1 %v1731_v19  ;;  %v1556_v13 = vld [vmem:[#allocation5 + $0x178] sm:$0xf0]  ;;  %v2032_v14 = vld [vmem:[#allocation5 + $0x274] sm:$0xf]  ;;  %v1690_v17 = vld [vmem:[#allocation5 + $0x280] sm:$0xf]  ;;  %v1447_v19 = vor.u32 %v1972_v3, %v1444_v5  ;;  %v1375_v27 = vor.u32 %v1954_v9, %v1372_v10 }
  0x46   :  { %782 = vmatpush.bf16.msrb.mxu0 %v1659_v25  ;;  %v1684_v16 = vld [vmem:[#allocation5 + $0x278] sm:$0xf0]  ;;  %v2035_v18 = vld [vmem:[#allocation5 + $0x284] sm:$0xf0]  ;;  %v108_v20 = vld [vmem:[#allocation2 + $0x20] sm:$0xff] }
  0x47   :  { %837 = vmatpush.bf16.msra.mxu2 %v1479_v22  ;;  %v115_v21 = vld [vmem:[#allocation2 + $0x58] sm:$0xff]  ;;  %v1970_v22 = vld [vmem:[#allocation5 + $0x84] sm:$0xf]  ;;  %v2016_v25 = vld [vmem:[#allocation5 + $0x1f4] sm:$0xf]  ;;  %v1687_v32 = vor.u32 %v2032_v14, %v1684_v16  ;;  %v1691_v33 = vor.u32 %v2035_v18, %v1690_v17 }
  0x48   :  { %824 = vmatpush.bf16.msrb.mxu3 %v1407_v28  ;;  %v1436_v24 = vld [vmem:[#allocation5 + $0x88] sm:$0xf0]  ;;  %v1620_v26 = vld [vmem:[#allocation5 + $0x1f8] sm:$0xf0]  ;;  %v1559_v28 = vor.u32 %v2000_v12, %v1556_v13  ;;  %v2048_v29 = vld [vmem:[#allocation5 + $0x2f4] sm:$0xf]  ;;  %v2354_v37 = vpack.c.bf16 %v115_v21, %v108_v20 }
  0x49   :  { %796 = vmatpush.bf16.msrb.mxu1 %v1723_v31  ;;  %v1748_v30 = vld [vmem:[#allocation5 + $0x2f8] sm:$0xf0]  ;;  %v116_v34 = vld [vmem:[#allocation2 + $0x60] sm:$0xff]  ;;  %v1548_v36 = vld [vmem:[#allocation5 + $0x168] sm:$0xf0]  ;;  %v1439_v38 = vor.u32 %v1970_v22, %v1436_v24  ;;  %v1623_v41 = vor.u32 %v2016_v25, %v1620_v26 }
  0x4a   :  { %783 = vmatpush.bf16.msrb.mxu0 %v1651_v39  ;;  %1760 = vmatmul.msk.bf16.vlgmr.msrb.gmra.mxu2 %vm719_vm0, %v2350_v48  ;;  %v109_v31 = vld [vmem:[#allocation2 + $0x28] sm:$0xff]  ;;  %v2030_v39 = vld [vmem:[#allocation5 + $0x264] sm:$0xf]  ;;  %v1676_v40 = vld [vmem:[#allocation5 + $0x268] sm:$0xf0] }
  0x4b   :  { %838 = vmatpush.bf16.msra.mxu2 %v1471_v35  ;;  %v1998_v35 = vld [vmem:[#allocation5 + $0x164] sm:$0xf]  ;;  %v2356_v44 = vpack.c.bf16 %v116_v34, %v109_v31  ;;  %v1612_v46 = vld [vmem:[#allocation5 + $0x1e8] sm:$0xf0]  ;;  %v1679_v50 = vor.u32 %v2030_v39, %v1676_v40  ;;  %v1996_v51 = vld [vmem:[#allocation5 + $0x154] sm:$0xf] }
  0x4c   :  { %825 = vmatpush.bf16.msrb.mxu3 %v1399_v42  ;;  %v1751_v42 = vor.u32 %v2048_v29, %v1748_v30  ;;  %v2014_v43 = vld [vmem:[#allocation5 + $0x1e4] sm:$0xf]  ;;  %v2028_v53 = vld [vmem:[#allocation5 + $0x254] sm:$0xf]  ;;  %v1668_v55 = vld [vmem:[#allocation5 + $0x258] sm:$0xf0] }
  0x4d   :  { %797 = vmatpush.bf16.msrb.mxu1 %v1715_v45  ;;  %v1551_v45 = vor.u32 %v1998_v35, %v1548_v36  ;;  %v2046_v47 = vld [vmem:[#allocation5 + $0x2e4] sm:$0xf]  ;;  %v2012_v58 = vld [vmem:[#allocation5 + $0x1d4] sm:$0xf]  ;;  %v1732_v0 = vld [vmem:[#allocation5 + $0x2d8] sm:$0xf0]  ;;  %v1671_v1 = vor.u32 %v2028_v53, %v1668_v55 }
  0x4e   :  { %784 = vmatpush.bf16.msrb.mxu0 %v1643_v52  ;;  %v1540_v52 = vld [vmem:[#allocation5 + $0x158] sm:$0xf0]  ;;  %v2044_v62 = vld [vmem:[#allocation5 + $0x2d4] sm:$0xf]  ;;  %v1532_v3 = vld [vmem:[#allocation5 + $0x148] sm:$0xf0] }
  0x4f   :  { %839 = vmatpush.bf16.msra.mxu2 %v1463_v49  ;;  %v1740_v49 = vld [vmem:[#allocation5 + $0x2e8] sm:$0xf0]  ;;  %v1543_v59 = vor.u32 %v1996_v51, %v1540_v52  ;;  %v2026_v5 = vld [vmem:[#allocation5 + $0x244] sm:$0xf]  ;;  %v1735_v8 = vor.u32 %v2044_v62, %v1732_v0  ;;  %v1524_v16 = vld [vmem:[#allocation5 + $0x138] sm:$0xf0] }
  0x50   :  { %826 = vmatpush.bf16.msrb.mxu3 %v1391_v56  ;;  %v1615_v56 = vor.u32 %v2014_v43, %v1612_v46  ;;  %v1743_v57 = vor.u32 %v2046_v47, %v1740_v49  ;;  %v1660_v6 = vld [vmem:[#allocation5 + $0x248] sm:$0xf0]  ;;  %v2010_v9 = vld [vmem:[#allocation5 + $0x1c4] sm:$0xf]  ;;  %v2024_v17 = vld [vmem:[#allocation5 + $0x234] sm:$0xf] }
  0x51   :  { %798 = vmatpush.bf16.msrb.mxu1 %v1707_v61  ;;  %v1604_v61 = vld [vmem:[#allocation5 + $0x1d8] sm:$0xf0]  ;;  %v1596_v10 = vld [vmem:[#allocation5 + $0x1c8] sm:$0xf0]  ;;  %v2042_v12 = vld [vmem:[#allocation5 + $0x2c4] sm:$0xf]  ;;  %v1663_v14 = vor.u32 %v2026_v5, %v1660_v6 }
  0x52   :  { %785 = vmatpush.bf16.msrb.mxu0 %v1635_v7  ;;  %v1607_v7 = vor.u32 %v2012_v58, %v1604_v61  ;;  %v1724_v13 = vld [vmem:[#allocation5 + $0x2c8] sm:$0xf0]  ;;  %v1599_v18 = vor.u32 %v2010_v9, %v1596_v10  ;;  %v1588_v21 = vld [vmem:[#allocation5 + $0x1b8] sm:$0xf0]  ;;  %v2040_v22 = vld [vmem:[#allocation5 + $0x2b4] sm:$0xf] }
  0x53   :  { %840 = vmatpush.bf16.msra.mxu2 %v1455_v2  ;;  %v1994_v2 = vld [vmem:[#allocation5 + $0x144] sm:$0xf]  ;;  %v1516_v26 = vld [vmem:[#allocation5 + $0x128] sm:$0xf0]  ;;  %v1508_v39 = vld [vmem:[#allocation5 + $0x118] sm:$0xf0] }
  0x54   :  { %827 = vmatpush.bf16.msrb.mxu3 %v1383_v11  ;;  %v1535_v11 = vor.u32 %v1994_v2, %v1532_v3  ;;  %v1990_v25 = vld [vmem:[#allocation5 + $0x124] sm:$0xf]  ;;  %v1708_v35 = vld [vmem:[#allocation5 + $0x2a8] sm:$0xf0]  ;;  %v2020_v40 = vld [vmem:[#allocation5 + $0x214] sm:$0xf] }
  0x55   :  { %799 = vmatpush.bf16.msrb.mxu1 %v1699_v15  ;;  %v1992_v15 = vld [vmem:[#allocation5 + $0x134] sm:$0xf]  ;;  %v2006_v31 = vld [vmem:[#allocation5 + $0x1a4] sm:$0xf]  ;;  %v1572_v47 = vld [vmem:[#allocation5 + $0x198] sm:$0xf0] }
  0x56   :  { %786 = vmatpush.bf16.msrb.mxu0 %v1627_v23  ;;  %v1527_v20 = vor.u32 %v1992_v15, %v1524_v16  ;;  %v1716_v23 = vld [vmem:[#allocation5 + $0x2b8] sm:$0xf0]  ;;  %v2038_v34 = vld [vmem:[#allocation5 + $0x2a4] sm:$0xf]  ;;  %v2036_v49 = vld [vmem:[#allocation5 + $0x294] sm:$0xf] }
  0x57   :  { %841 = vmatpush.bf16.msra.mxu2 %v1447_v19  ;;  %v2008_v19 = vld [vmem:[#allocation5 + $0x1b4] sm:$0xf]  ;;  %v1719_v30 = vor.u32 %v2040_v22, %v1716_v23  ;;  %v1711_v43 = vor.u32 %v2038_v34, %v1708_v35  ;;  %v1986_v52 = vld [vmem:[#allocation5 + $0x104] sm:$0xf]  ;;  %v1500_v53 = vld [vmem:[#allocation5 + $0x108] sm:$0xf0] }
  0x58   :  { %828 = vmatpush.bf16.msrb.mxu3 %v1375_v27  ;;  %v2022_v27 = vld [vmem:[#allocation5 + $0x224] sm:$0xf]  ;;  %v1591_v29 = vor.u32 %v2008_v19, %v1588_v21  ;;  %v1756_v58 = vld [vmem:[#allocation5 + $0x308] sm:$0xf0]  ;;  %v1503_v62 = vor.u32 %v1986_v52, %v1500_v53  ;;  %v1812_v15 = vld [vmem:[#allocation8 + $0x60] sm:$0xf] }
  0x59   :  { %800 = vmatpush.bf16.msrb.mxu1 %v1691_v33  ;;  %787 = vmatmul.bf16.vlgmr.msrb.gmra.mxu0 %v2354_v37  ;;  %v1580_v33 = vld [vmem:[#allocation5 + $0x1a8] sm:$0xf0]  ;;  %v2018_v55 = vld [vmem:[#allocation5 + $0x204] sm:$0xf]  ;;  %v2065_v16 = vld [vmem:[#allocation8 + $0x64] sm:$0xf0] }
  0x5a   :  { %849 = vmatpush.bf16.msra.mxu0 %v1559_v28  ;;  %v1644_v28 = vld [vmem:[#allocation5 + $0x228] sm:$0xf0]  ;;  %v2002_v0 = vld [vmem:[#allocation5 + $0x184] sm:$0xf]  ;;  %v2061_v21 = vld [vmem:[#allocation8 + $0x44] sm:$0xf0] }
  0x5b   :  { %842 = vmatpush.bf16.msra.mxu2 %v1439_v38  ;;  %829 = vmatmul.bf16.vlgmr.msrb.gmra.mxu3 %v2340_v60  ;;  %v1727_v60 = vor.u32 %v2042_v12, %v1724_v13  ;;  %v1647_v36 = vor.u32 %v2022_v27, %v1644_v28  ;;  %v1988_v38 = vld [vmem:[#allocation5 + $0x114] sm:$0xf]  ;;  %v2034_v3 = vld [vmem:[#allocation5 + $0x284] sm:$0xf]  ;;  %v1692_v5 = vld [vmem:[#allocation5 + $0x288] sm:$0xf0] }
  0x5c   :  { %877 = vmatpush.bf16.msra.mxu3 %v1687_v32  ;;  %801 = vmatmul.bf16.vlgmr.msrb.gmra.mxu1 %v2356_v44  ;;  %v1519_v32 = vor.u32 %v1990_v25, %v1516_v26  ;;  %v1511_v46 = vor.u32 %v1988_v38, %v1508_v39  ;;  %v1820_v9 = vld [vmem:[#allocation8 + $0x70] sm:$0xf]  ;;  %v2067_v10 = vld [vmem:[#allocation8 + $0x74] sm:$0xf0]  ;;  %v1822_v13 = vld [vmem:[#allocation8 + $0x78] sm:$0xf0] }
  0x5d   :  { %863 = vmatpush.bf16.msra.mxu1 %v1623_v41  ;;  %v1636_v41 = vld [vmem:[#allocation5 + $0x218] sm:$0xf0]  ;;  %v1821_v12 = vor.u32 %v2067_v10, %v1820_v9  ;;  %v2060_v22 = vld [vmem:[#allocation8 + $0x44] sm:$0xf]  ;;  %v1788_v26 = vld [vmem:[#allocation8 + $0x30] sm:$0xf] }
  0x5e   :  { %850 = vmatpush.bf16.msra.mxu0 %v1551_v45  ;;  %843 = vmatmul.bf16.vlgmr.msra.gmra.mxu2 %v2344_v4  ;;  %v1652_v4 = vld [vmem:[#allocation5 + $0x238] sm:$0xf0]  ;;  %v2004_v45 = vld [vmem:[#allocation5 + $0x194] sm:$0xf]  ;;  %v1639_v51 = vor.u32 %v2020_v40, %v1636_v41  ;;  %v2059_v27 = vld [vmem:[#allocation8 + $0x34] sm:$0xf0] }
  0x5f   :  { %891 = vmatpush.bf16.msrb.mxu2 %v1751_v42  ;;  %v1655_v24 = vor.u32 %v2024_v17, %v1652_v4  ;;  %v1583_v42 = vor.u32 %v2006_v31, %v1580_v33  ;;  %v2064_v17 = vld [vmem:[#allocation8 + $0x64] sm:$0xf]  ;;  %v2058_v28 = vld [vmem:[#allocation8 + $0x34] sm:$0xf]  ;;  %v2057_v33 = vld [vmem:[#allocation8 + $0x24] sm:$0xf0] }
  0x60   :  { %878 = vmatpush.bf16.msra.mxu3 %v1679_v50  ;;  %v1700_v50 = vld [vmem:[#allocation5 + $0x298] sm:$0xf0]  ;;  %v2056_v34 = vld [vmem:[#allocation8 + $0x24] sm:$0xf]  ;;  %v1772_v39 = vld [vmem:[#allocation8 + $0x10] sm:$0xf] }
  0x61   :  { %864 = vmatpush.bf16.msra.mxu1 %v1615_v56  ;;  %v1628_v56 = vld [vmem:[#allocation5 + $0x208] sm:$0xf0]  ;;  %v1703_v61 = vor.u32 %v2036_v49, %v1700_v50  ;;  %v2054_v41 = vld [vmem:[#allocation8 + $0x14] sm:$0xf]  ;;  %v1764_v50 = vld [vmem:[#allocation8] sm:$0xf] }
  0x62   :  { %851 = vmatpush.bf16.msra.mxu0 %v1543_v59  ;;  %v1575_v59 = vor.u32 %v2004_v45, %v1572_v47  ;;  %v1631_v2 = vor.u32 %v2018_v55, %v1628_v56  ;;  %v2055_v40 = vld [vmem:[#allocation8 + $0x14] sm:$0xf0]  ;;  %v2052_v52 = vld [vmem:[#allocation8 + $0x4] sm:$0xf]  ;;  %v1766_v55 = vld [vmem:[#allocation8 + $0x8] sm:$0xf0] }
  0x63   :  { %892 = vmatpush.bf16.msrb.mxu2 %v1743_v57  ;;  %v2050_v57 = vld [vmem:[#allocation5 + $0x304] sm:$0xf]  ;;  %v1886_v9 = vld [vmem:[#allocation8 + $0xf8] sm:$0xf0] }
  0x64   :  { %879 = vmatpush.bf16.msra.mxu3 %v1671_v1  ;;  %v1564_v1 = vld [vmem:[#allocation5 + $0x188] sm:$0xf0]  ;;  %v1759_v6 = vor.u32 %v2050_v57, %v1756_v58  ;;  %v1769_v57 = vor.u32 %v2052_v52, %v1766_v55  ;;  %v1844_v52 = vld [vmem:[#allocation8 + $0xa0] sm:$0xf] }
  0x65   :  { %865 = vmatpush.bf16.msra.mxu1 %v1607_v7  ;;  %v1567_v7 = vor.u32 %v2002_v0, %v1564_v1 }
  0x66   :  { %852 = vmatpush.bf16.msra.mxu0 %v1535_v11  ;;  %v2066_v11 = vld [vmem:[#allocation8 + $0x74] sm:$0xf] }
  0x67   :  { %893 = vmatpush.bf16.msrb.mxu2 %v1735_v8  ;;  %v1695_v8 = vor.u32 %v2034_v3, %v1692_v5  ;;  %v1884_v5 = vld [vmem:[#allocation8 + $0xf0] sm:$0xf] }
  0x68   :  { %880 = vmatpush.bf16.msra.mxu3 %v1663_v14  ;;  %v1825_v14 = vor.u32 %v2066_v11, %v1822_v13  ;;  %v1876_v13 = vld [vmem:[#allocation8 + $0xe0] sm:$0xf] }
  0x69   :  { %866 = vmatpush.bf16.msra.mxu1 %v1599_v18  ;;  %v2063_v18 = vld [vmem:[#allocation8 + $0x54] sm:$0xf0] }
  0x6a   :  { %853 = vmatpush.bf16.msra.mxu0 %v1527_v20  ;;  %v1796_v20 = vld [vmem:[#allocation8 + $0x40] sm:$0xf] }
  0x6b   :  { %894 = vmatpush.bf16.msrb.mxu2 %v1727_v60  ;;  %v1806_v60 = vld [vmem:[#allocation8 + $0x58] sm:$0xf0]  ;;  %v1797_v23 = vor.u32 %v2061_v21, %v1796_v20  ;;  %v2078_v20 = vld [vmem:[#allocation8 + $0xd4] sm:$0xf] }
  0x6c   :  { %881 = vmatpush.bf16.msra.mxu3 %v1655_v24  ;;  %v1798_v24 = vld [vmem:[#allocation8 + $0x48] sm:$0xf0] }
  0x6d   :  { %867 = vmatpush.bf16.msra.mxu1 %v1591_v29  ;;  %v1801_v25 = vor.u32 %v2060_v22, %v1798_v24  ;;  %v1789_v29 = vor.u32 %v2059_v27, %v1788_v26  ;;  %v1860_v27 = vld [vmem:[#allocation8 + $0xc0] sm:$0xf] }
  0x6e   :  { %854 = vmatpush.bf16.msra.mxu0 %v1519_v32  ;;  %v1780_v32 = vld [vmem:[#allocation8 + $0x20] sm:$0xf] }
  0x6f   :  { %895 = vmatpush.bf16.msrb.mxu2 %v1719_v30  ;;  %v1790_v30 = vld [vmem:[#allocation8 + $0x38] sm:$0xf0]  ;;  %v1781_v35 = vor.u32 %v2057_v33, %v1780_v32  ;;  %v1862_v32 = vld [vmem:[#allocation8 + $0xc8] sm:$0xf0] }
  0x70   :  { %882 = vmatpush.bf16.msra.mxu3 %v1647_v36  ;;  %v1793_v31 = vor.u32 %v2058_v28, %v1790_v30  ;;  %v1782_v36 = vld [vmem:[#allocation8 + $0x28] sm:$0xf0]  ;;  %v2077_v28 = vld [vmem:[#allocation8 + $0xc4] sm:$0xf0] }
  0x71   :  { %868 = vmatpush.bf16.msra.mxu1 %v1583_v42  ;;  %v1785_v38 = vor.u32 %v2056_v34, %v1782_v36  ;;  %v1773_v42 = vor.u32 %v2055_v40, %v1772_v39  ;;  %v1861_v30 = vor.u32 %v2077_v28, %v1860_v27  ;;  %v1852_v40 = vld [vmem:[#allocation8 + $0xb0] sm:$0xf] }
  0x72   :  { %855 = vmatpush.bf16.msra.mxu0 %v1511_v46  ;;  %v2368_v46 = vld [vmem:[#allocation7] sm:$0x3] }
  0x73   :  { %896 = vmatpush.bf16.msrb.mxu2 %v1711_v43  ;;  %v1774_v43 = vld [vmem:[#allocation8 + $0x18] sm:$0xf0]  ;;  %v225_v58 = vperm.slane %v2368_v46, 0 }
  0x74   :  { %883 = vmatpush.bf16.msra.mxu3 %v1639_v51  ;;  %v1777_v45 = vor.u32 %v2054_v41, %v1774_v43  ;;  %v2053_v51 = vld [vmem:[#allocation8 + $0x4] sm:$0xf0]  ;;  %v2075_v41 = vld [vmem:[#allocation8 + $0xb4] sm:$0xf0] }
  0x75   :  { %869 = vmatpush.bf16.msra.mxu1 %v1575_v59  ;;  %v1765_v53 = vor.u32 %v2053_v51, %v1764_v50  ;;  %v1853_v43 = vor.u32 %v2075_v41, %v1852_v40  ;;  %v2089_v40 = vld [vmem:[#allocation10 + $0x28] sm:$0xff] }
  0x76   :  { %856 = vmatpush.bf16.msra.mxu0 %v1503_v62  ;;  %v2097_v41 = vld [vmem:[#allocation10 + $0x68] sm:$0xff] }
  0x77   :  { %897 = vmatpush.bf16.msrb.mxu2 %v1703_v61 }
  0x78   :  { %884 = vmatpush.bf16.msra.mxu3 %v1631_v2 }
  0x79   :  { %870 = vmatpush.bf16.msra.mxu1 %v1567_v7  ;;  %857 = vmatmul.bf16.vlgmr.msra.gmra.mxu0 %v2338_v54  ;;  %v1813_v54 = vor.u32 %v2065_v16, %v1812_v15  ;;  %v2082_v7 = vld [vmem:[#allocation8 + $0xf4] sm:$0xf]  ;;  %v2080_v15 = vld [vmem:[#allocation8 + $0xe4] sm:$0xf] }
  0x7a   :  { %912 = vmatpush.bf16.msrb.mxu0 %v1759_v6  ;;  %v2083_v6 = vld [vmem:[#allocation8 + $0xf4] sm:$0xf0]  ;;  %v1889_v11 = vor.u32 %v2082_v7, %v1886_v9  ;;  %v1828_v7 = vld [vmem:[#allocation8 + $0x80] sm:$0xf]  ;;  %v2068_v9 = vld [vmem:[#allocation8 + $0x84] sm:$0xf] }
  0x7b   :  { %885 = vmatmul.bf16.vlgmr.msra.gmra.mxu3 %v2354_v37  ;;  %898 = vmatpush.bf16.msrb.mxu2 %v1695_v8  ;;  %v1814_v37 = vld [vmem:[#allocation8 + $0x68] sm:$0xf0]  ;;  %v1885_v8 = vor.u32 %v2083_v6, %v1884_v5 }
  0x7c   :  { %871 = vmatmul.bf16.vlgmr.msra.gmra.mxu1 %v2342_v63  ;;  %v1817_v4 = vor.u32 %v2064_v17, %v1814_v37  ;;  %v1804_v63 = vld [vmem:[#allocation8 + $0x50] sm:$0xf]  ;;  %v1878_v37 = vld [vmem:[#allocation8 + $0xe8] sm:$0xf0] }
  0x7d   :  { %1123 = vmatpush.bf16.msrb.mxu1 %v1821_v12  ;;  %1137 = vmatpush.bf16.msrb.mxu3 %v1885_v8  ;;  %v2069_v8 = vld [vmem:[#allocation8 + $0x84] sm:$0xf0] }
  0x7e   :  { %899 = vmatmul.bf16.vlgmr.msrb.gmra.mxu2 %v2356_v44  ;;  %1151 = vmatpush.bf16.msra.mxu0 %v1825_v14  ;;  %v2062_v44 = vld [vmem:[#allocation8 + $0x54] sm:$0xf]  ;;  %v2081_v14 = vld [vmem:[#allocation8 + $0xe4] sm:$0xf0] }
  0x7f   :  { %v1809_v19 = vor.u32 %v2062_v44, %v1806_v60  ;;  %1165 = vmatpush.bf16.msra.mxu2 %v1889_v11  ;;  %v1830_v11 = vld [vmem:[#allocation8 + $0x88] sm:$0xf0] }
  0x81   :  { %1124 = vmatpush.bf16.msrb.mxu1 %v1813_v54  ;;  %v1877_v54 = vor.u32 %v2081_v14, %v1876_v13  ;;  %v226_v13 = vperm.slane %v2368_v46, 1 }
  0x82   :  { %1152 = vmatpush.bf16.msra.mxu0 %v1817_v4 }
  0x83   :  { %1138 = vmatpush.bf16.msrb.mxu3 %v1877_v54 }
  0x86   :  { %1153 = vmatpush.bf16.msra.mxu0 %v1809_v19  ;;  %v2079_v19 = vld [vmem:[#allocation8 + $0xd4] sm:$0xf0] }
  0x89   :  { %1761 = vmatmul.msk.bf16.vlgmr.msrb.gmra.mxu0 %vm719_vm0, %v2350_v48  ;;  %v1805_v48 = vor.u32 %v2063_v18, %v1804_v63  ;;  %v1881_v63 = vor.u32 %v2080_v15, %v1878_v37 }
  0x8a   :  { %1154 = vmatpush.bf16.msra.mxu0 %v1801_v25 }
  0x8b   :  { %1125 = vmatpush.bf16.msrb.mxu1 %v1805_v48  ;;  %1166 = vmatpush.bf16.msra.mxu2 %v1881_v63  ;;  %v1868_v48 = vld [vmem:[#allocation8 + $0xd0] sm:$0xf] }
  0x8c   :  { %v1869_v22 = vor.u32 %v2079_v19, %v1868_v48 }
  0x8e   :  { %1155 = vmatpush.bf16.msra.mxu0 %v1793_v31  ;;  %1139 = vmatpush.bf16.msrb.mxu3 %v1869_v22  ;;  %v2076_v31 = vld [vmem:[#allocation8 + $0xc4] sm:$0xf] }
  0x8f   :  { %1126 = vmatpush.bf16.msrb.mxu1 %v1797_v23  ;;  %v1870_v23 = vld [vmem:[#allocation8 + $0xd8] sm:$0xf0]  ;;  %v1865_v34 = vor.u32 %v2076_v31, %v1862_v32 }
  0x90   :  { %v1873_v24 = vor.u32 %v2078_v20, %v1870_v23 }
  0x92   :  { %1156 = vmatpush.bf16.msra.mxu0 %v1785_v38  ;;  %1167 = vmatpush.bf16.msra.mxu2 %v1873_v24 }
  0x93   :  { %1127 = vmatpush.bf16.msrb.mxu1 %v1789_v29  ;;  %1140 = vmatpush.bf16.msrb.mxu3 %v1861_v30 }
  0x96   :  { %1157 = vmatpush.bf16.msra.mxu0 %v1777_v45  ;;  %1168 = vmatpush.bf16.msra.mxu2 %v1865_v34  ;;  %v1854_v45 = vld [vmem:[#allocation8 + $0xb8] sm:$0xf0] }
  0x97   :  { %1128 = vmatpush.bf16.msrb.mxu1 %v1781_v35  ;;  %1141 = vmatpush.bf16.msrb.mxu3 %v1853_v43  ;;  %v2096_v43 = vld [vmem:[#allocation10 + $0x60] sm:$0xff] }
  0x9a   :  { %1158 = vmatpush.bf16.msra.mxu0 %v1769_v57  ;;  %v1846_v57 = vld [vmem:[#allocation8 + $0xa8] sm:$0xf0] }
  0x9b   :  { %1129 = vmatpush.bf16.msrb.mxu1 %v1773_v42  ;;  %v2074_v42 = vld [vmem:[#allocation8 + $0xb4] sm:$0xf] }
  0x9f   :  { %1130 = vmatpush.bf16.msrb.mxu1 %v1765_v53  ;;  %v2073_v53 = vld [vmem:[#allocation8 + $0xa4] sm:$0xf0] }
  0xa0   :  { %v1845_v55 = vor.u32 %v2073_v53, %v1844_v52  ;;  %v2093_v52 = vld [vmem:[#allocation10 + $0x48] sm:$0xff]  ;;  %v2084_v53 = vld [vmem:[#allocation10] sm:$0xff] }
  0xa2   :  { %1142 = vmatpush.bf16.msrb.mxu3 %v1845_v55  ;;  %v2092_v55 = vld [vmem:[#allocation10 + $0x40] sm:$0xff] }
  0xb6   :  { %v732_v47 = vpop.f32.mrf.mxu0 }
  0xb7   :  { %v733_v59 = vadd.f32 %v732_v47, %v225_v58 }
  0xb9   :  { %v746_v56 = vpop.f32.mrf.mxu1 }
  0xba   :  { %v747_v0 = vadd.f32 %v746_v56, %v733_v59  ;;  %v2072_v56 = vld [vmem:[#allocation8 + $0xa4] sm:$0xf] }
  0xbb   :  { %v1849_v59 = vor.u32 %v2072_v56, %v1846_v57 }
  0xbd   :  { %v760_v49 = vpop.f32.mrf.mxu2 }
  0xbe   :  { %v734_v61 = vpop.f32.mrf.mxu0  ;;  %v774_v1 = vpop.f32.mrf.mxu3  ;;  %v761_v10 = vadd.f32 %v760_v49, %v747_v0  ;;  %v1857_v49 = vor.u32 %v2074_v42, %v1854_v45  ;;  %v2071_v0 = vld [vmem:[#allocation8 + $0x94] sm:$0xf0]  ;;  %v2088_v42 = vld [vmem:[#allocation10 + $0x20] sm:$0xff] }
  0xbf   :  { %v735_v3 = vadd.f32 %v734_v61, %v225_v58  ;;  %v2087_v45 = vld [vmem:[#allocation10 + $0x18] sm:$0xff] }
  0xc0   :  { %v775_v4 = vadd.f32 %v774_v1, %v761_v10  ;;  %1169 = vmatpush.bf16.msra.mxu2 %v1857_v49  ;;  %v2070_v1 = vld [vmem:[#allocation8 + $0x94] sm:$0xf]  ;;  %v1829_v10 = vor.u32 %v2069_v8, %v1828_v7 }
  0xc1   :  { %v748_v2 = vpop.f32.mrf.mxu1  ;;  %v2086_v49 = vld [vmem:[#allocation10 + $0x10] sm:$0xff] }
  0xc2   :  { %v749_v12 = vadd.f32 %v748_v2, %v735_v3  ;;  %v1838_v3 = vld [vmem:[#allocation8 + $0x98] sm:$0xf0] }
  0xc3   :  { %v1841_v6 = vor.u32 %v2070_v1, %v1838_v3 }
  0xc4   :  { %1170 = vmatpush.bf16.msra.mxu2 %v1849_v59 }
  0xc5   :  { %v762_v62 = vpop.f32.mrf.mxu2 }
  0xc6   :  { %v763_v44 = vadd.f32 %v762_v62, %v749_v12  ;;  %v776_v21 = vpop.f32.mrf.mxu3  ;;  %v1836_v62 = vld [vmem:[#allocation8 + $0x90] sm:$0xf]  ;;  %v1833_v12 = vor.u32 %v2068_v9, %v1830_v11 }
  0xc7   :  { %v1837_v2 = vor.u32 %v2071_v0, %v1836_v62 }
  0xc8   :  { %v777_v25 = vadd.f32 %v776_v21, %v763_v44  ;;  %1171 = vmatpush.bf16.msra.mxu2 %v1841_v6 }
  0xc9   :  { %1143 = vmatpush.bf16.msrb.mxu3 %v1837_v2 }
  0xcc   :  { %1172 = vmatpush.bf16.msra.mxu2 %v1833_v12 }
  0xcd   :  { %v816_v17 = vpop.f32.mrf.mxu2  ;;  %1144 = vmatpush.bf16.msrb.mxu3 %v1829_v10 }
  0xd5   :  { %v818_v36 = vpop.f32.mrf.mxu2 }
  0xd6   :  { %v788_v16 = vpop.f32.mrf.mxu0 }
  0xd7   :  { %v789_v60 = vadd.f32 %v788_v16, %v775_v4 }
  0xd9   :  { %v802_v18 = vpop.f32.mrf.mxu1 }
  0xda   :  { %v803_v26 = vadd.f32 %v802_v18, %v789_v60 }
  0xdc   :  { %v817_v38 = vadd.f32 %v816_v17, %v803_v26 }
  0xde   :  { %v790_v29 = vpop.f32.mrf.mxu0  ;;  %v919_v50 = vmax.f32 %v817_v38, 0.0  ;;  %v830_v61 = vpop.f32.mrf.mxu3  ;;  %v2090_v38 = vld [vmem:[#allocation10 + $0x30] sm:$0xff] }
  0xdf   :  { %v791_v33 = vadd.f32 %v790_v29, %v777_v25  ;;  %v831_v17 = vadd.f32 %v830_v61, %v226_v13 }
  0xe1   :  { %v804_v35 = vpop.f32.mrf.mxu1  ;;  %v844_v5 = vpop.f32.mrf.mxu2 }
  0xe2   :  { %v805_v39 = vadd.f32 %v804_v35, %v791_v33  ;;  %v845_v37 = vadd.f32 %v844_v5, %v831_v17  ;;  %v2091_v35 = vld [vmem:[#allocation10 + $0x38] sm:$0xff] }
  0xe3   :  { %1317 = vmatpush.bf16.msra.mxu1 %v2091_v35 }
  0xe4   :  { %v819_v47 = vadd.f32 %v818_v36, %v805_v39  ;;  %v2099_v36 = vld [vmem:[#allocation10 + $0x78] sm:$0xff]  ;;  %v2098_v39 = vld [vmem:[#allocation10 + $0x70] sm:$0xff] }
  0xe5   :  { %1331 = vmatpush.bf16.msra.mxu3 %v2099_v36 }
  0xe6   :  { %v921_v51 = vmax.f32 %v819_v47, 0.0  ;;  %v832_v14 = vpop.f32.mrf.mxu3  ;;  %v2095_v47 = vld [vmem:[#allocation10 + $0x58] sm:$0xff] }
  0xe7   :  { %v833_v4 = vadd.f32 %v832_v14, %v226_v13  ;;  %1318 = vmatpush.bf16.msra.mxu1 %v2090_v38 }
  0xe8   :  { %v923_v58 = vpack.c.bf16 %v921_v51, %v919_v50  ;;  %v2094_v50 = vld [vmem:[#allocation10 + $0x50] sm:$0xff]  ;;  %v2085_v51 = vld [vmem:[#allocation10 + $0x8] sm:$0xff] }
  0xe9   :  { %v846_v16 = vpop.f32.mrf.mxu2  ;;  %1332 = vmatpush.bf16.msra.mxu3 %v2098_v39 }
  0xea   :  { %1131 = vmatmul.bf16.vlgmr.msrb.gmra.mxu1 %v923_v58  ;;  %1159 = vmatmul.bf16.vlgmr.msra.gmra.mxu0 %v923_v58  ;;  %v847_v60 = vadd.f32 %v846_v16, %v833_v4  ;;  %v957_v58 = vld [vmem:[%s2388_s4] sm:$0x3] }
  0xeb   :  { %1319 = vmatpush.bf16.msra.mxu1 %v2089_v40  ;;  %v959_v62 = vperm.slane %v957_v58, 0  ;;  %v960_v0 = vperm.slane %v957_v58, 1 }
  0xed   :  { %1333 = vmatpush.bf16.msra.mxu3 %v2097_v41 }
  0xef   :  { %1320 = vmatpush.bf16.msra.mxu1 %v2088_v42 }
  0xf1   :  { %1334 = vmatpush.bf16.msra.mxu3 %v2096_v43 }
  0xf3   :  { %1321 = vmatpush.bf16.msra.mxu1 %v2087_v45 }
  0xf5   :  { %1335 = vmatpush.bf16.msra.mxu3 %v2095_v47 }
  0xf6   :  { %v858_v15 = vpop.f32.mrf.mxu0 }
  0xf7   :  { %v859_v48 = vadd.f32 %v858_v15, %v845_v37  ;;  %1322 = vmatpush.bf16.msra.mxu1 %v2086_v49 }
  0xf9   :  { %v872_v54 = vpop.f32.mrf.mxu1  ;;  %1336 = vmatpush.bf16.msra.mxu3 %v2094_v50 }
  0xfa   :  { %v873_v21 = vadd.f32 %v872_v54, %v859_v48 }
  0xfb   :  { %1323 = vmatpush.bf16.msra.mxu1 %v2085_v51 }
  0xfd   :  { %1337 = vmatpush.bf16.msra.mxu3 %v2093_v52 }
  0xfe   :  { %v886_v63 = vpop.f32.mrf.mxu3  ;;  %v860_v18 = vpop.f32.mrf.mxu0 }
  0xff   :  { %v861_v19 = vadd.f32 %v860_v18, %v847_v60  ;;  %v887_v24 = vadd.f32 %v886_v63, %v873_v21  ;;  %1324 = vmatpush.bf16.msra.mxu1 %v2084_v53  ;;  %v2112_v63 = vld [vmem:[%s2390_s6] ss:$0 sm:$0xff] }
 0x101   :  { %v900_v44 = vpop.f32.mrf.mxu2  ;;  %v874_v20 = vpop.f32.mrf.mxu1  ;;  %1338 = vmatpush.bf16.msra.mxu3 %v2092_v55 }
 0x102   :  { %v875_v46 = vadd.f32 %v874_v20, %v861_v19  ;;  %v901_v27 = vadd.f32 %v900_v44, %v887_v24 }
 0x106   :  { %v888_v22 = vpop.f32.mrf.mxu3  ;;  %v914_v23 = vpop.f32.mrf.mxu0 }
 0x107   :  { %v889_v25 = vadd.f32 %v888_v22, %v875_v46  ;;  %v915_v28 = vadd.f32 %v914_v23, %v901_v27 }
 0x109   :  { %v902_v26 = vpop.f32.mrf.mxu2  ;;  %v920_v32 = vmax.f32 %v915_v28, 0.0 }
 0x10a   :  { %v903_v29 = vadd.f32 %v902_v26, %v889_v25 }
 0x10e   :  { %v916_v30 = vpop.f32.mrf.mxu0 }
 0x10f   :  { %v917_v31 = vadd.f32 %v916_v30, %v903_v29 }
 0x111   :  { %v922_v33 = vmax.f32 %v917_v31, 0.0 }
 0x113   :  { %v924_v34 = vpack.c.bf16 %v922_v33, %v920_v32 }
 0x115   :  { %1145 = vmatmul.bf16.vlgmr.msrb.gmra.mxu3 %v924_v34  ;;  %1173 = vmatmul.bf16.vlgmr.msra.gmra.mxu2 %v924_v34 }
 0x167   :  { %v1132_v56 = vpop.f32.mrf.mxu1  ;;  %v1160_v57 = vpop.f32.mrf.mxu0 }
 0x168   :  { %v1133_v3 = vadd.f32 %v1132_v56, %v959_v62  ;;  %v1161_v5 = vadd.f32 %v1160_v57, %v960_v0 }
 0x16f   :  { %v1134_v1 = vpop.f32.mrf.mxu1  ;;  %v1162_v2 = vpop.f32.mrf.mxu0 }
 0x170   :  { %v1135_v6 = vadd.f32 %v1134_v1, %v959_v62  ;;  %v1163_v7 = vadd.f32 %v1162_v2, %v960_v0 }
 0x198   :  { %v1146_v59 = vpop.f32.mrf.mxu3  ;;  %v1174_v61 = vpop.f32.mrf.mxu2 }
 0x199   :  { %v1147_v8 = vadd.f32 %v1146_v59, %v1133_v3  ;;  %v1175_v9 = vadd.f32 %v1174_v61, %v1161_v5 }
 0x19b   :  { %v1179_v14 = vmax.f32 %v1147_v8, 0.0  ;;  %v1180_v15 = vmax.f32 %v1175_v9, 0.0 }
 0x1a0   :  { %v1148_v10 = vpop.f32.mrf.mxu3  ;;  %v1176_v11 = vpop.f32.mrf.mxu2 }
 0x1a1   :  { %v1149_v12 = vadd.f32 %v1148_v10, %v1135_v6  ;;  %v1177_v13 = vadd.f32 %v1176_v11, %v1163_v7 }
 0x1a3   :  { %v1181_v16 = vmax.f32 %v1149_v12, 0.0  ;;  %v1182_v17 = vmax.f32 %v1177_v13, 0.0 }
 0x1a5   :  { %v1183_v54 = vpack.c.bf16 %v1181_v16, %v1179_v14  ;;  %v1184_v37 = vpack.c.bf16 %v1182_v17, %v1180_v15 }
 0x1a7   :  { %1325 = vmatmul.bf16.vlgmr.msra.gmra.mxu1 %v1183_v54  ;;  %1339 = vmatmul.bf16.vlgmr.msra.gmra.mxu3 %v1184_v37 }
 0x224   :  { %v1326_v4 = vpop.f32.mrf.mxu1 }
 0x225   :  { %v1327_v18 = vadd.f32 %v2112_v63, %v1326_v4 }
 0x22a   :  { %v1340_v44 = vpop.f32.mrf.mxu3 }
 0x22b   :  { %v1341_v60 = vadd.f32 %v1340_v44, %v1327_v18 }
 0x22c   :  { %v1328_v48 = vpop.f32.mrf.mxu1 }
 0x22d   :  { %1345 = vst [vmem:[#allocation11] sm:$0xff] %v1341_v60  ;;  %v1329_v19 = vadd.f32 %v2112_v63, %v1328_v48 }
 0x232   :  { %v1342_v20 = vpop.f32.mrf.mxu3 }
 0x233   :  { %v1343_v21 = vadd.f32 %v1342_v20, %v1329_v19 }
 0x235   :  { %1346 = vst [vmem:[#allocation11 + $0x8] sm:$0xff] %v1343_v21 }
 0x236   :  { %1359 = dma.vmem_to_hbm [thread:$0]  %s1352_s8, 256, %s1354_s13, [#allocation4], %s2266_s9, %s2266_s9, %s2267_s10  }
 0x237   :  { %2263 = dma.done.wait [#allocation4], 256  }
 0x238   :  { %2264 = vsyncadd [#allocation4], 4294967040 }
 0x239   :  { %1364 = vsyncpa [#allocation3], 1 }
 0x23a   :  { %1365 = vsyncpa [#allocation6], 1 }
 0x23b   :  { %1366 = vsyncpa [#allocation9], 1 }
 0x23c   :  { %1367 = vsyncpa [#allocation4], 1 }

</bundles_post_ra>
